<compile_context>
chip_gen: v7x
topology: tpu7x:2x2x1
jax: 0.10.0
libtpu: 0.0.40
codegen_flags: <defaults>
</compile_context>

<pallas_src>
import jax
import jax.numpy as jnp
from jax.experimental import pallas as pl
from jax.experimental.pallas import tpu as pltpu

_LANES = 128
_MIN_PALLAS_BYTES = 1 << 20  # below ~1 MiB/tensor, plain jnp (XLA fusion) wins


def _bag_kernel(p_ref, i_ref, d_ref, o_ref):
    # sigmoid + blend in f32 (EUP exp; huge VALU slack so f32 math is free),
    # single cast at the store. Blend rewritten as i + e*(p - i).
    e = jax.nn.sigmoid(d_ref[...].astype(jnp.float32))
    pf = p_ref[...].astype(jnp.float32)
    jf = i_ref[...].astype(jnp.float32)
    o_ref[...] = (jf + e * (pf - jf)).astype(o_ref.dtype)


def _bag_jnp(p, i, d):
    e = jax.nn.sigmoid(d.astype(jnp.float32))
    pf = p.astype(jnp.float32)
    jf = i.astype(jnp.float32)
    return (jf + e * (pf - jf)).astype(p.dtype)


def _sublane_pack(dtype):
    # sublane packing multiple: 8 for f32, 16 for bf16, 32 for int8/fp8
    return max(8, 32 // jnp.dtype(dtype).itemsize)


def _round_up(x, m):
    return ((x + m - 1) // m) * m


def _vmem_cap_bytes():
    try:
        cap = int(pltpu.get_tpu_info().vmem_capacity_bytes)
        if cap > 0:
            return cap
    except Exception:
        pass
    return 64 << 20  # conservative (v7x per-TC VMEM)


def _bag_pallas_rows(p2, i2, d2, tile_rows):
    """p2/i2/d2: (rows, 128) lane-dense slabs of identical dtype."""
    rows = p2.shape[0]
    dtype = p2.dtype
    itemsize = jnp.dtype(dtype).itemsize
    pack = _sublane_pack(dtype)

    # VMEM budget: 3 inputs + 1 output, double-buffered, minus headroom for
    # compiler-internal scratch. Never over-request on v7x's 64 MiB.
    cap = _vmem_cap_bytes()
    budget = max(cap - (16 << 20), 8 << 20)
    max_block_bytes = budget // (4 * 2)
    max_tr = max((max_block_bytes // (_LANES * itemsize)) // pack * pack, pack)

    # Keep at least 2 blocks so both v7x TensorCores get work on the
    # "parallel" grid axis (no effect on single-TC v5e/v6e).
    half = _round_up(pl.cdiv(rows, 2), pack)

    tr = min(tile_rows, max_tr, half)
    tr = max((tr // pack) * pack, pack)
    if tr >= rows:
        tr = rows  # full-extent block is always a legal block shape

    grid = (pl.cdiv(rows, tr),)
    spec = pl.BlockSpec((tr, _LANES), lambda r: (r, 0))

    # Advisory cost estimate so XLA can schedule/overlap around the call.
    n = rows * _LANES
    cost = pl.CostEstimate(
        flops=4 * n,
        transcendentals=n,
        bytes_accessed=4 * n * itemsize,  # 3 inputs + 1 output
    )

    block_bytes = tr * _LANES * itemsize
    footprint = 4 * 2 * block_bytes  # 3 in + 1 out, double-buffered
    vmem_limit = None
    if footprint > (12 << 20):
        vmem_limit = min(footprint + (8 << 20), cap - (8 << 20))

    return pl.pallas_call(
        _bag_kernel,
        out_shape=jax.ShapeDtypeStruct((rows, _LANES), dtype),
        grid_spec=pltpu.PrefetchScalarGridSpec(
            num_scalar_prefetch=0,
            grid=grid,
            in_specs=[spec, spec, spec],
            out_specs=spec,
        ),
        compiler_params=pltpu.CompilerParams(
            dimension_semantics=("parallel",),  # v7x: shard blocks across 2 TCs
            vmem_limit_bytes=vmem_limit,
        ),
        cost_estimate=cost,
    )(p2, i2, d2)


def bag(p, i, d, *, tile_rows=8192, use_pallas=None):
    """edge_att = sigmoid(d); out = edge_att * p + (1 - edge_att) * i.

    p, i, d: arrays of identical shape/dtype (NCHW or any shape). Elementwise.
    use_pallas: None = auto (size threshold), True/False = force a path.
    """
    assert p.shape == i.shape == d.shape
    assert p.dtype == i.dtype == d.dtype

    total = p.size
    itemsize = jnp.dtype(p.dtype).itemsize
    if use_pallas is None:
        use_pallas = total * itemsize >= _MIN_PALLAS_BYTES

    main = (total // _LANES) * _LANES
    if (not use_pallas) or main == 0:
        return _bag_jnp(p, i, d)

    pf, jf, df = p.reshape(-1), i.reshape(-1), d.reshape(-1)

    if main == total:
        # Aligned hot path: pure bitcast reshape, zero wrapper copies.
        out = _bag_pallas_rows(
            pf.reshape(-1, _LANES), jf.reshape(-1, _LANES), df.reshape(-1, _LANES),
            tile_rows)
        return out.reshape(p.shape)

    # Ragged: aligned prefix through the kernel, <128-element tail in jnp.
    out_main = _bag_pallas_rows(
        pf[:main].reshape(-1, _LANES),
        jf[:main].reshape(-1, _LANES),
        df[:main].reshape(-1, _LANES),
        tile_rows).reshape(-1)
    out_tail = _bag_jnp(pf[main:], jf[main:], df[main:])
    return jnp.concatenate([out_main, out_tail]).reshape(p.shape)


def bag_ref(p, i, d):
    edge_att = jax.nn.sigmoid(d.astype(jnp.float32))
    return (edge_att * p + (1.0 - edge_att) * i).astype(p.dtype)


if __name__ == "__main__":
    key = jax.random.PRNGKey(0)

    # Small NCHW demo (matching the PyTorch module's conv-feature-map usage).
    B, C, H, W = 2, 4, 16, 16
    kp, ki, kd = jax.random.split(key, 3)
    p = jax.random.normal(kp, (B, C, H, W), dtype=jnp.float32)
    i = jax.random.normal(ki, (B, C, H, W), dtype=jnp.float32)
    d = jax.random.normal(kd, (B, C, H, W), dtype=jnp.float32)

    # Force the Pallas path so the kernel is actually exercised at demo size.
    out = bag(p, i, d, use_pallas=True)
    jax.block_until_ready(out)
    ref = bag_ref(p, i, d)
    assert out.shape == (B, C, H, W)
    assert jnp.allclose(out, ref, atol=1e-5, rtol=1e-5), "f32 mismatch vs reference"

    # Auto path (small input → jnp bypass) must also match.
    out_auto = bag(p, i, d)
    jax.block_until_ready(out_auto)
    assert jnp.allclose(out_auto, ref, atol=1e-5, rtol=1e-5), "auto-path mismatch"

    # Ragged total (378 elements, not a multiple of 128): kernel prefix + jnp tail.
    kp2, ki2, kd2 = jax.random.split(jax.random.PRNGKey(1), 3)
    rs = (2, 3, 7, 9)
    pr = jax.random.normal(kp2, rs, dtype=jnp.float32)
    ir = jax.random.normal(ki2, rs, dtype=jnp.float32)
    dr = jax.random.normal(kd2, rs, dtype=jnp.float32)
    out_r = bag(pr, ir, dr, use_pallas=True)
    jax.block_until_ready(out_r)
    assert jnp.allclose(out_r, bag_ref(pr, ir, dr), atol=1e-5, rtol=1e-5), "ragged mismatch"

    # bf16 inputs: tiles stay bf16, blend happens in f32 vregs.
    pb, ib, db = (x.astype(jnp.bfloat16) for x in (p, i, d))
    out_b = bag(pb, ib, db, use_pallas=True)
    jax.block_until_ready(out_b)
    ref_b = bag_ref(pb, ib, db).astype(jnp.float32)
    assert jnp.allclose(out_b.astype(jnp.float32), ref_b, atol=2e-2, rtol=2e-2), "bf16 mismatch"

    print("KERNEL_OK")
</pallas_src>

<mosaic_0001>
module attributes {stable_mosaic.version = 11 : i64} {
  func.func @_bag_kernel(%arg0: i32, %arg1: memref<8x128xf32, #tpu.memory_space<vmem>>, %arg2: memref<8x128xf32, #tpu.memory_space<vmem>>, %arg3: memref<8x128xf32, #tpu.memory_space<vmem>>, %arg4: memref<8x128xf32, #tpu.memory_space<vmem>>) attributes {dimension_semantics = [#tpu.dimension_semantics<parallel>], iteration_bounds = array<i64: 2>, scalar_prefetch = 0 : i64, scratch_operands = 0 : i64, tpu.core_type = #tpu.core_type<tc>, window_params = [{transform_indices = @transform_0, window_bounds = array<i64: 8, 128>}, {transform_indices = @transform_1, window_bounds = array<i64: 8, 128>}, {transform_indices = @transform_2, window_bounds = array<i64: 8, 128>}, {transform_indices = @transform_3, window_bounds = array<i64: 8, 128>}]} {
    %c0 = arith.constant 0 : index
    %c0_0 = arith.constant 0 : index
    %0 = vector.load %arg3[%c0, %c0_0] : memref<8x128xf32, #tpu.memory_space<vmem>>, vector<8x128xf32>
    %1 = arith.negf %0 : vector<8x128xf32>
    %2 = math.exp %1 : vector<8x128xf32>
    %cst = arith.constant 1.000000e+00 : f32
    %3 = vector.broadcast %cst : f32 to vector<8x128xf32>
    %4 = arith.addf %3, %2 : vector<8x128xf32>
    %5 = arith.divf %3, %4 : vector<8x128xf32>
    %c0_1 = arith.constant 0 : index
    %c0_2 = arith.constant 0 : index
    %6 = vector.load %arg1[%c0_1, %c0_2] : memref<8x128xf32, #tpu.memory_space<vmem>>, vector<8x128xf32>
    %c0_3 = arith.constant 0 : index
    %c0_4 = arith.constant 0 : index
    %7 = vector.load %arg2[%c0_3, %c0_4] : memref<8x128xf32, #tpu.memory_space<vmem>>, vector<8x128xf32>
    %8 = arith.subf %6, %7 : vector<8x128xf32>
    %9 = arith.mulf %5, %8 : vector<8x128xf32>
    %10 = arith.addf %7, %9 : vector<8x128xf32>
    %c0_5 = arith.constant 0 : index
    %c0_6 = arith.constant 0 : index
    %11 = vector.load %arg4[%c0_5, %c0_6] : memref<8x128xf32, #tpu.memory_space<vmem>>, vector<8x128xf32>
    tpu.vector_store %arg4[%c0_5, %c0_6], %10 {strides = array<i32>} : memref<8x128xf32, #tpu.memory_space<vmem>>, vector<8x128xf32>,
    return
  }
  func.func @transform_0(%arg0: i32) -> (i32, i32) {
    %c0_i32 = arith.constant 0 : i32
    %c0_i32_0 = arith.constant 0 : i32
    return %arg0, %c0_i32 : i32, i32
  }
  func.func @transform_1(%arg0: i32) -> (i32, i32) {
    %c0_i32 = arith.constant 0 : i32
    %c0_i32_0 = arith.constant 0 : i32
    return %arg0, %c0_i32 : i32, i32
  }
  func.func @transform_2(%arg0: i32) -> (i32, i32) {
    %c0_i32 = arith.constant 0 : i32
    %c0_i32_0 = arith.constant 0 : i32
    return %arg0, %c0_i32 : i32, i32
  }
  func.func @transform_3(%arg0: i32) -> (i32, i32) {
    %c0_i32 = arith.constant 0 : i32
    %c0_i32_0 = arith.constant 0 : i32
    return %arg0, %c0_i32 : i32, i32
  }
}

</mosaic_0001>

<bundles_post_ra>
// kernel: tpu_custom_call.1
= control target key start
LH: loop header
LB: loop body
LE: loop exit
PB: predicated region body
PF: predicated region fallthrough
CT: control target
= control target key end

     0   :  { %s891_s0 = inlined_call_operand.hbm [shape: f32[16,128], index: 0, kind: input, shape index: {}]   ;;  %s892_s1 = inlined_call_operand.hbm [shape: f32[16,128], index: 1, kind: input, shape index: {}]   ;;  %s893_s2 = inlined_call_operand.hbm [shape: f32[16,128], index: 2, kind: input, shape index: {}]   ;;  %s894_s3 = inlined_call_operand.hbm [shape: f32[16,128], index: 3, kind: output, shape index: {}]  }
   0x1   :  { %899 = sst [smem:[#allocation12_spill]] %s892_s1 }
   0x2   :  { %8 = vsyncpa [#allocation3], 0 }
   0x3   :  { %10 = vsyncpa [#allocation3 + $0x1], 0 }
   0x4   :  { %11 = vsyncpa [#allocation6], 0 }
   0x5   :  { %13 = vsyncpa [#allocation6 + $0x1], 0 }
   0x6   :  { %14 = vsyncpa [#allocation4], 0 }
   0x7   :  { %16 = vsyncpa [#allocation4 + $0x1], 0  ;;  %s662_s12 = smov 0   ;;  %s664_s13 = smov 0  }
   0x8   :  { %s666_s14 = smov 0   ;;  %s668_s15 = smov 0  }
   0x9 LB: > { %s683_s16 = sadd.s32 4294967295, %s636_s15   ;;  %s397_s17 = sadd.s32 4294967294, %s636_s15   ;;  %s636_s15 = sphi %s668_s15, %s918_s15   ;;  %s632_s14 = sphi %s666_s14, %s917_s14   ;;  %s628_s13 = sphi %s664_s13, %s916_s13   ;;  %s624_s12 = sphi %s662_s12, %s915_s12  }
   0xa   : > { %s687_s18 = sadd.s32 1, %s636_s15   ;;  %s29_s19 = sadd.s32 1, %s632_s14 }
   0xb   : > { %s26_s20 = ssub.s32 %s636_s15, %s687_s18  ;;  %p36_p0 = scmp.ne.s32.totalorder %s632_s14, %s628_s13 }
   0xc   : > { %p27_p1 = scmp.eq.s32.totalorder %s26_s20, 0  ;;  %p37_p2 = scmp.eq.s32.totalorder %s636_s15, 0 }
   0xd   : > { %p42_p3 = scmp.ne.s32.totalorder %s628_s13, %s624_s12  ;;  %p43_p4 = scmp.eq.s32.totalorder %s683_s16, 0 }
   0xe   : > { %s699_s21 = scalar_select %p27_p1, %s632_s14, %s29_s19  }
   0xf   : > { %p38_p5 = por %p37_p2, %p36_p0  ;;  %p701_p6 = por %p43_p4, %p42_p3 }
  0x10   : > { %p118_p7 = scmp.eq.s32.totalorder %s683_s16, 1  ;;  %p124_p8 = scmp.eq.s32.totalorder %s397_s17, 1 }
  0x11   : > { %s900_s22 = scalar_select %p701_p6, 1, 0 }
  0x12   : > { %p438_p10 = scmp.lt.s32.totalorder %s636_s15, 2  ;;  %p708_p11 = por %p118_p7, %p36_p0 }
  0x13   : > { %p712_p12 = por %p124_p8, %p42_p3  ;;  %s144_s25 = sand.u32 1, %s632_s14  }
  0x14   : > { %s901_s23 = scalar_select %p708_p11, 1, 0 }
  0x15   : > { %s902_s24 = scalar_select %p712_p12, 1, 0 }
  0x16   : > { %s718_s26 = sshll.u32 %s636_s15, 7  ;;  %s722_s27 = sshll.u32 %s144_s25, 3 }
  0x17   : > { %p724_p13 = pnand %p438_p10, %p38_p5  ;;  %s162_s29 = sand.u32 1, %s636_s15  }
  0x18   : > { %s904_s1 = sld [smem:[#allocation12_spill]]  ;;  %s166_s6 = scalar_lea.vmem [#allocation5], %s722_s27 }
  0x19   : > { %s903_s28 = scalar_select %p724_p13, 1, 0 }
  0x1a   : > { %s173_s7 = sshll.u32 %s166_s6, 4  ;;  %s739_s8 = scalar_lea.sflag [#allocation6], %s162_s29  ;;  %s736_s7 = int_to_ptr.vmem [resolvable:$true] %s173_s7 }
  0x1b   : > { %p745_p2 = pneg %p724_p13 }
  0x1e   : > { %s733_s5 = scalar_lea.hbm %s904_s1, %s718_s26  ;;  %s481_s19 = scalar_lea.hbm %s904_s1, 256 }
  0x1f   : > { %s476_s9 = scalar_lea.hbm %s733_s5, 128  ;;  %p482_p5 = scmp.lt.u32.totalorder %s733_s5, %s904_s1 }
  0x20   : > { %p477_p1 = scmp.ne.s32.totalorder %s733_s5, %s476_s9  ;;  %p483_p7 = scmp.lt.u32.totalorder %s481_s19, %s476_s9 }
  0x21   : > { %p485_p10 = scmp.lt.u32.totalorder %s476_s9, %s733_s5 }
  0x22   : > { %p479_p3 = pnand %p745_p2, %p477_p1  ;;  %p484_p8 = por %p483_p7, %p482_p5 }
  0x24   : > { %p480_p4 = pneg %p479_p3  ;;  %p486_p9 = por %p485_p10, %p484_p8 }
  0x26   : > { %p487_p0 = pnand %p486_p9, %p480_p4 }
  0x28   : > { %490 = shalt.err (!%p487_p0)
}
  0x29   : > { %s491_s29 = scalar_lea.vmem %s736_s7, 128  ;;  %s638_s4 = smov [#allocation5]  }
  0x2a   : > { %p492_p1 = scmp.ne.s32.totalorder %s736_s7, %s491_s29  ;;  %s496_s6 = sshll.u32 %s638_s4, 4  ;;  %s497_s6 = int_to_ptr.vmem [resolvable:$false] %s496_s6 }
  0x2b   : > { %s498_s11 = scalar_lea.vmem %s497_s6, 256  ;;  %p499_p11 = scmp.lt.s32.totalorder %s736_s7, %s497_s6 }
  0x2c   : > { %p494_p3 = pnand %p492_p1, %p745_p2  ;;  %p500_p6 = scmp.lt.s32.totalorder %s498_s11, %s491_s29 }
  0x2e   : > { %p495_p12 = pneg %p494_p3  ;;  %p501_p5 = por %p500_p6, %p499_p11 }
  0x30   : > { %p502_p7 = pnand %p501_p5, %p495_p12 }
  0x32   : > { %505 = shalt.err (!%p502_p7)
}
  0x33   : > { %430 = dma.hbm_to_vmem [thread:$0]  (!%p724_p13), %s733_s5, 128, %s736_s7, %s739_s8  }
  0x34   : > { %p196_p9 = scmp.lt.s32.totalorder %s636_s15, 3  ;;  %s774_s19 = scalar_lea.hbm %s891_s0, %s718_s26 }
  0x35   : > { %p906_p6 = scmp.ge.s32.totalorder %s636_s15, 1  ;;  %s148_s30 = scalar_lea.vmem [#allocation2], %s722_s27 }
  0x36   : > { %s155_s29 = sshll.u32 %s148_s30, 4  ;;  %s145_s5 = scalar_lea.sflag [#allocation3], %s144_s25  ;;  %s156_s29 = int_to_ptr.vmem [resolvable:$true] %s155_s29 }
  0x37   : > { %p778_p11 = pnand %p906_p6, %p196_p9  ;;  %s506_s7 = scalar_lea.hbm %s774_s19, 128 }
  0x38   : > { %p507_p12 = scmp.ne.s32.totalorder %s774_s19, %s506_s7  ;;  %s511_s11 = scalar_lea.hbm %s891_s0, 256 }
  0x39   : > { %s907_s20 = scalar_select %p778_p11, 1, 0 }
  0x3a   : > { %p509_p0 = pnand %p507_p12, %p745_p2  ;;  %p512_p8 = scmp.lt.u32.totalorder %s774_s19, %s891_s0 }
  0x3b   : > { %p513_p10 = scmp.lt.u32.totalorder %s511_s11, %s506_s7  ;;  %p515_p3 = scmp.lt.u32.totalorder %s506_s7, %s774_s19 }
  0x3c   : > { %p510_p4 = pneg %p509_p0 }
  0x3d   : > { %p514_p1 = por %p513_p10, %p512_p8 }
  0x3f   : > { %p516_p5 = por %p515_p3, %p514_p1 }
  0x41   : > { %p517_p7 = pnand %p516_p5, %p510_p4 }
  0x43   : > { %520 = shalt.err (!%p517_p7)
}
  0x44   : > { %s521_s25 = scalar_lea.vmem %s156_s29, 128  ;;  %s639_s30 = smov [#allocation2]  }
  0x45   : > { %p522_p9 = scmp.ne.s32.totalorder %s156_s29, %s521_s25  ;;  %s526_s1 = sshll.u32 %s639_s30, 4  ;;  %s527_s1 = int_to_ptr.vmem [resolvable:$false] %s526_s1 }
  0x46   : > { %s528_s4 = scalar_lea.vmem %s527_s1, 256  ;;  %p529_p0 = scmp.lt.s32.totalorder %s156_s29, %s527_s1 }
  0x47   : > { %p524_p6 = pnand %p522_p9, %p745_p2  ;;  %p530_p11 = scmp.lt.s32.totalorder %s528_s4, %s521_s25 }
  0x49   : > { %p525_p12 = pneg %p524_p6  ;;  %p531_p13 = por %p530_p11, %p529_p0 }
  0x4b   : > { %p532_p8 = pnand %p531_p13, %p525_p12 }
  0x4d   : > { %535 = shalt.err (!%p532_p8)
}
  0x4e   : > { %p908_p10 = scmp.ne.s32.totalorder %s903_s28, 0  ;;  %s806_s11 = scalar_lea.hbm %s893_s2, %s718_s26 }
  0x4f   : > { %s184_s1 = scalar_lea.vmem [#allocation7], %s722_s27  ;;  %s536_s17 = scalar_lea.hbm %s806_s11, 128 }
  0x50   : > { %427 = dma.hbm_to_vmem [thread:$0]  (!%p908_p10), %s774_s19, 128, %s156_s29, %s145_s5  }
  0x51   : > { %s191_s9 = sshll.u32 %s184_s1, 4  ;;  %p537_p13 = scmp.ne.s32.totalorder %s806_s11, %s536_s17  ;;  %s192_s9 = int_to_ptr.vmem [resolvable:$true] %s191_s9 }
  0x52   : > { %s541_s19 = scalar_lea.hbm %s893_s2, 256  ;;  %p542_p1 = scmp.lt.u32.totalorder %s806_s11, %s893_s2 }
  0x53   : > { %p539_p11 = pnand %p537_p13, %p745_p2  ;;  %p543_p3 = scmp.lt.u32.totalorder %s541_s19, %s536_s17 }
  0x54   : > { %p545_p7 = scmp.lt.u32.totalorder %s536_s17, %s806_s11 }
  0x55   : > { %p540_p4 = pneg %p539_p11  ;;  %p544_p5 = por %p543_p3, %p542_p1 }
  0x57   : > { %p546_p9 = por %p545_p7, %p544_p5 }
  0x59   : > { %p547_p6 = pnand %p546_p9, %p540_p4 }
  0x5b   : > { %550 = shalt.err (!%p547_p6)
}
  0x5c   : > { %s551_s26 = scalar_lea.vmem %s192_s9, 128  ;;  %s640_s27 = smov [#allocation7]  }
  0x5d   : > { %p552_p12 = scmp.ne.s32.totalorder %s192_s9, %s551_s26  ;;  %s556_s4 = sshll.u32 %s640_s27, 4  ;;  %s557_s4 = int_to_ptr.vmem [resolvable:$false] %s556_s4 }
  0x5e   : > { %s558_s7 = scalar_lea.vmem %s557_s4, 256  ;;  %p559_p13 = scmp.lt.s32.totalorder %s192_s9, %s557_s4 }
  0x5f   : > { %p554_p0 = pnand %p552_p12, %p745_p2  ;;  %p560_p11 = scmp.lt.s32.totalorder %s558_s7, %s551_s26 }
  0x61   : > { %p555_p8 = pneg %p554_p0  ;;  %p561_p10 = por %p560_p11, %p559_p13 }
  0x63   : > { %p562_p1 = pnand %p561_p10, %p555_p8 }
  0x65   : > { %565 = shalt.err (!%p562_p1)
}
  0x66   : > { %p909_p3 = scmp.ne.s32.totalorder %s903_s28, 0  ;;  %p910_p4 = scmp.ne.s32.totalorder %s907_s20, 0 }
  0x67   : > { %s830_s10 = sand.u32 (!%p910_p4), 1, %s628_s13   ;;  %p911_p2 = scmp.ne.s32.totalorder (!%p910_p4), %s900_s22, 0 }
  0x68   : > { %433 = dma.hbm_to_vmem [thread:$0]  (!%p909_p3), %s806_s11, 128, %s192_s9, %s739_s8  }
  0x69   : > { %200 = sbr.rel (%p910_p4) target bundleno = 162 (0xa2), region = 32  ;;  %s407_s6 = sshll.u32 (!%p910_p4), %s830_s10, 3 }
  0x6a   : > { %s203_s1 = scalar_lea.sflag (!%p910_p4), [#allocation3], %s830_s10  ;;  %s206_s17 = scalar_lea.vmem (!%p910_p4), [#allocation2], %s407_s6 }
  0x70   : > { %611 = dma.done.wait (%p911_p2), %s203_s1, 128  }
  0x71   : > { %613 = vsyncadd (%p911_p2), %s203_s1, 4294967168  ;;  %s211_s28 = sand.u32 1, %s683_s16   ;;  %s215_s20 = scalar_lea.vmem [#allocation5], %s407_s6 }
  0x72   : > { %s212_s8 = scalar_lea.sflag [#allocation6], %s211_s28 }
  0x73   : > { %615 = dma.done.wait (%p911_p2), %s212_s8, 256  }
  0x74   : > { %617 = vsyncadd (%p911_p2), %s212_s8, 4294967040  ;;  %s224_s11 = scalar_lea.vmem [#allocation7], %s407_s6  ;;  %v264_v4 = vld [vmem:[%s206_s17] sm:$0xff]  ;;  %v265_v5 = vld [vmem:[%s215_s20] sm:$0xff]  ;;  %s256_s9 = scalar_lea.vmem [#allocation8], %s407_s6 }
  0x75   : > { %v257_v0 = vld [vmem:[%s224_s11] sm:$0xff]  ;;  %v266_v6 = vsub.f32 %v264_v4, %v265_v5  ;;  %s284_s25 = sshll.u32 %s256_s9, 4  ;;  %s413_s30 = sshll.u32 %s683_s16, 7  ;;  %s844_s25 = int_to_ptr.vmem [resolvable:$true] %s284_s25 }
  0x76   : > { %v411_v1 = vmul.f32 -1.442695, %v257_v0  ;;  %s849_s29 = scalar_lea.hbm %s894_s3, %s413_s30  ;;  %s271_s5 = scalar_lea.sflag [#allocation4], %s830_s10 }
  0x77   : > { %s566_s26 = scalar_lea.vmem %s844_s25, 128  ;;  %p912_p5 = scmp.ne.s32.totalorder %s901_s23, 0 }
  0x78   : > { %472 = vpow2.f32 %v411_v1  ;;  %p567_p10 = scmp.ne.s32.totalorder %s844_s25, %s566_s26  ;;  %s641_s16 = smov [#allocation8]  }
  0x79   : > { %s570_s27 = sshll.u32 %s641_s16, 4  ;;  %s571_s27 = int_to_ptr.vmem [resolvable:$false] %s570_s27 }
  0x7a   : > { %p568_p7 = pnand %p567_p10, %p912_p5  ;;  %s572_s4 = scalar_lea.vmem %s571_s27, 256 }
  0x7b   : > { %p573_p6 = scmp.lt.s32.totalorder %s844_s25, %s571_s27  ;;  %p574_p12 = scmp.lt.s32.totalorder %s572_s4, %s566_s26 }
  0x7c   : > { %p569_p9 = pneg %p568_p7 }
  0x7d   : > { %p575_p0 = por %p574_p12, %p573_p6 }
  0x7f   : > { %p576_p8 = pnand %p575_p0, %p569_p9 }
  0x82   : > { %v473_v2 = vpop.eup %472 }
  0x83   : > { %v261_v3 = vadd.f32 1.0, %v473_v2 }
  0x85   : > { %474 = vrcp.f32 %v261_v3 }
  0x8f   : > { %v475_v7 = vpop.eup %474 }
  0x90   : > { %v267_v8 = vmul.f32 %v475_v7, %v266_v6 }
  0x92   : > { %v268_v9 = vadd.f32 %v267_v8, %v265_v5 }
  0x94   : > { %269 = vst [vmem:[%s256_s9] sm:$0xff] %v268_v9 }
  0x95   : > { %579 = shalt.err (!%p576_p8)
}
  0x96   : > { %s580_s7 = scalar_lea.hbm %s849_s29, 128  ;;  %s584_s1 = scalar_lea.hbm %s894_s3, 256 }
  0x97   : > { %p581_p13 = scmp.ne.s32.totalorder %s849_s29, %s580_s7  ;;  %p585_p3 = scmp.lt.u32.totalorder %s849_s29, %s894_s3 }
  0x98   : > { %p586_p4 = scmp.lt.u32.totalorder %s584_s1, %s580_s7  ;;  %p588_p10 = scmp.lt.u32.totalorder %s580_s7, %s849_s29 }
  0x99   : > { %p582_p11 = pnand %p581_p13, %p912_p5 }
  0x9a   : > { %p587_p2 = por %p586_p4, %p585_p3 }
  0x9b   : > { %p583_p1 = pneg %p582_p11 }
  0x9c   : > { %p589_p7 = por %p588_p10, %p587_p2 }
  0x9e   : > { %p590_p9 = pnand %p589_p7, %p583_p1 }
  0xa0   : > { %593 = shalt.err (!%p590_p9)
}
  0xa1   : > { %422 = dma.vmem_to_hbm [thread:$0]  (%p912_p5), %s844_s25, 128, %s849_s29, %s271_s5  }
  0xa2 PF: > { %s296_s8 = sand.u32 1, %s624_s12   ;;  %p913_p6 = scmp.ne.s32.totalorder %s902_s24, 0 }
  0xa3   : > { %p914_p12 = scmp.ge.s32.totalorder %s636_s15, 2  ;;  %s297_s20 = scalar_lea.sflag [#allocation4], %s296_s8 }
  0xa5   : > { %p435_p0 = pnand %p914_p12, %p913_p6 }
  0xa7   : > { %619 = dma.done.wait (!%p435_p0), %s297_s20, 128  }
  0xa8   : > { %621 = vsyncadd (!%p435_p0), %s297_s20, 4294967168  ;;  %p19_p8 = scmp.ge.s32.totalorder %s687_s18, 4   ;;  %s915_s12 = smov %s628_s13 }
  0xa9   : > { %s916_s13 = smov %s632_s14  ;;  %s917_s14 = smov %s699_s21 }
  0xaa   : > { %s918_s15 = smov %s687_s18  ;;  %21 = sbr.rel (!%p19_p8) target bundleno = 9 (0x9), region = 101 }
  0xb1   :  { %302 = vsyncpa [#allocation3], 1 }
  0xb2   :  { %304 = vsyncpa [#allocation3 + $0x1], 1 }
  0xb3   :  { %305 = vsyncpa [#allocation6], 1 }
  0xb4   :  { %307 = vsyncpa [#allocation6 + $0x1], 1 }
  0xb5   :  { %308 = vsyncpa [#allocation4], 1 }
  0xb6   :  { %310 = vsyncpa [#allocation4 + $0x1], 1 }

</bundles_post_ra>
